<compile_context>
chip_gen: v7x
topology: tpu7x:2x2x1
jax: 0.10.0
libtpu: 0.0.40
codegen_flags: <defaults>
</compile_context>

<pallas_src>
import jax
import jax.numpy as jnp
from jax.experimental import pallas as pl
from jax.experimental.pallas import tpu as pltpu

NUM_HIDDEN = 64
RBF_NUM = 16
TOP_K = 5
D_MAX = 20.0
LN_EPS = 1e-5
COMPUTE_DTYPE = jnp.bfloat16        # MXU-native on v5e/v6e/v7x; LN math stays f32.


# ----------------------------------------------------------------------------
# Pallas kernel: fused  y = LayerNorm(x @ W + b) * gamma + beta
# Operands arrive "pair-packed": each kernel row holds TWO logical rows
# (features concatenated); the block-diagonal, mean-folded weight produces both
# 64-wide results side by side in the 128-lane output row.
# ----------------------------------------------------------------------------
def _linear_ln_kernel(x_ref, w_ref, bgb_ref, mavg_ref, o_ref):
    x = x_ref[...]                                               # (TM2, 2*Fp) compute dtype
    w = w_ref[...]                                               # (2*Fp, 128) compute dtype
    bgb = bgb_ref[...]                                           # (3, 128) f32
    m = mavg_ref[...]                                            # (128, 128) f32

    # Mean subtraction is folded into w / bias -> the GEMM directly yields
    # d = y - mean(y) per 64-lane group (f32 accumulation on the MXU).
    d = jnp.dot(x, w, preferred_element_type=jnp.float32) + bgb[0:1, :]

    # Per-64-lane-group variance via one small MXU matmul (group averaging).
    var = jnp.dot(d * d, m, preferred_element_type=jnp.float32)
    yn = d * jax.lax.rsqrt(var + LN_EPS)

    o_ref[...] = (yn * bgb[1:2, :] + bgb[2:3, :]).astype(o_ref.dtype)


def linear_layernorm(x2d, w, b, gamma, beta, *, block_pairs=512,
                     compute_dtype=COMPUTE_DTYPE):
    """x2d: [R, Fx] (fast path: Fx already zero-padded to a multiple of 128 and
    already in `compute_dtype` -> no extra HBM passes here), w: [F, H],
    b/gamma/beta: [H]  ->  [R, H] float32.

    Two consecutive rows are packed into one 128-lane output row (H=64), so
    every store is a full unmasked 128-lane vst.  LayerNorm mean subtraction is
    folded into the (block-diagonal) weight and bias; the per-64-lane-group
    variance is one (128,128) MXU matmul.  LN math / accumulation are f32.
    """
    R, Fx = x2d.shape
    F, H = w.shape
    H2 = 2 * H                                                   # 128 lanes

    # --- contraction-dim padding / cast (no-ops when caller pre-built) -----
    F_pad = pl.cdiv(max(Fx, F), 128) * 128
    if Fx != F_pad:
        x2d = jnp.pad(x2d, ((0, 0), (0, F_pad - Fx)))
    if x2d.dtype != compute_dtype:
        x2d = x2d.astype(compute_dtype)

    # --- row parity for pair-packing (at most one extra zero row) ----------
    if R % 2 != 0:
        x2d = jnp.pad(x2d, ((0, 1), (0, 0)))
    R_even = x2d.shape[0]
    R2 = R_even // 2
    xp = x2d.reshape(R2, 2 * F_pad)          # free: row-major view, no data movement

    # --- fold LayerNorm mean-subtraction into weight & bias (f32, exact-ish) -
    w32 = w.astype(jnp.float32)
    w_fold = w32 - jnp.mean(w32, axis=1, keepdims=True)
    b32 = b.astype(jnp.float32)
    b_fold = b32 - jnp.mean(b32)
    w_p = jnp.zeros((F_pad, H), jnp.float32).at[:F, :].set(w_fold)

    # --- block-diagonal weight: two packed rows -> one 128-lane output row -
    wbd = jnp.zeros((2 * F_pad, H2), compute_dtype)
    wbd = wbd.at[:F_pad, :H].set(w_p.astype(compute_dtype))
    wbd = wbd.at[F_pad:, H:].set(w_p.astype(compute_dtype))

    # --- folded-bias / gamma / beta packed into one small operand ----------
    bgb = jnp.stack([jnp.concatenate([b_fold, b_fold]),
                     jnp.concatenate([gamma, gamma]),
                     jnp.concatenate([beta, beta])], axis=0).astype(jnp.float32)

    # --- group-averaging matrix for the per-64-lane variance reduction -----
    grp = jnp.arange(H2) // H
    mavg = jnp.where(grp[:, None] == grp[None, :], 1.0 / H, 0.0).astype(jnp.float32)

    # --- row tiling: big tiles, but keep >= 2 grid steps when possible so
    #     both v7x TensorCores get work; ragged last block handled by Pallas.
    TM2 = min(block_pairs, max(8, pl.cdiv(pl.cdiv(R2, 2), 8) * 8))
    grid = (pl.cdiv(R2, TM2),)

    out = pl.pallas_call(
        _linear_ln_kernel,
        out_shape=jax.ShapeDtypeStruct((R2, H2), jnp.float32),
        grid_spec=pltpu.PrefetchScalarGridSpec(
            num_scalar_prefetch=0,
            grid=grid,
            in_specs=[
                pl.BlockSpec((TM2, 2 * F_pad), lambda i: (i, 0)),   # x pairs
                pl.BlockSpec((2 * F_pad, H2), lambda i: (0, 0)),    # weight (resident)
                pl.BlockSpec((3, H2), lambda i: (0, 0)),            # b / gamma / beta
                pl.BlockSpec((H2, H2), lambda i: (0, 0)),           # group-mean matrix
            ],
            out_specs=pl.BlockSpec((TM2, H2), lambda i: (i, 0)),    # lane-dense store
        ),
        compiler_params=pltpu.CompilerParams(
            dimension_semantics=("parallel",)),
    )(xp, wbd, bgb, mavg)

    return out.reshape(R_even, H)[:R]


# ----------------------------------------------------------------------------
# Plain-JAX geometric feature extraction (matches the PyTorch reference)
# ----------------------------------------------------------------------------
def _normalize(x, axis=-1, eps=1e-12):
    n = jnp.linalg.norm(x, axis=axis, keepdims=True)
    return x / jnp.maximum(n, eps)


def _gather_neighbors(x, idx):
    # x: [B, N, ...], idx: [B, N, K]  ->  [B, N, K, ...]
    B = x.shape[0]
    return x[jnp.arange(B)[:, None, None], idx]


def _rbf(D, num=RBF_NUM, d_min=0.0, d_max=D_MAX):
    mu = jnp.linspace(d_min, d_max, num)
    sigma = (d_max - d_min) / num
    return jnp.exp(-(((D[..., None] - mu) / sigma) ** 2))


def _distance(X, mask, eps=1e-6):
    # X: [B, N, 3] (Ca coords), mask: [B, N]
    mask_2D = mask[:, None, :] * mask[:, :, None]             # [B, N, N]
    dX = X[:, None, :, :] - X[:, :, None, :]                  # [B, N, N, 3]
    D = mask_2D * jnp.sqrt(jnp.sum(dX ** 2, axis=3) + eps)
    D_max = jnp.max(D, axis=-1, keepdims=True)
    D_adjust = D + (1.0 - mask_2D) * D_max
    _, E_idx = jax.lax.top_k(-D_adjust, TOP_K)                # smallest-k
    return E_idx


def _node_angle(X, mask, eps=1e-7):
    B, N = X.shape[0], X.shape[1]
    Xb = jnp.reshape(X[:, :, :3], (B, 3 * N, 3))
    dX = Xb[:, 1:] - Xb[:, :-1]
    U = _normalize(dX, axis=-1)
    u_2, u_1, u_0 = U[:, :-2], U[:, 1:-1], U[:, 2:]
    n_2 = _normalize(jnp.cross(u_2, u_1), axis=-1)
    n_1 = _normalize(jnp.cross(u_1, u_0), axis=-1)
    cosD = jnp.clip(jnp.sum(n_2 * n_1, -1), -1 + eps, 1 - eps)
    D = jnp.sign(jnp.sum(u_2 * n_1, -1)) * jnp.arccos(cosD)
    D = jnp.pad(D, ((0, 0), (1, 2)))
    D = jnp.reshape(D, (B, -1, 3))
    dihedral = jnp.concatenate([jnp.cos(D), jnp.sin(D)], -1)
    cosD = jnp.clip(jnp.sum(u_2 * u_1, -1), -1 + eps, 1 - eps)
    D = jnp.arccos(cosD)
    D = jnp.pad(D, ((0, 0), (1, 2)))
    D = jnp.reshape(D, (B, -1, 3))
    bond_angles = jnp.concatenate([jnp.cos(D), jnp.sin(D)], -1)
    node_angles = jnp.concatenate([dihedral, bond_angles], -1)  # [B, N, 12]
    # `last` may be -1 for an all-masked row -> wraps to the final residue,
    # exactly like the negative index in the PyTorch reference.
    last = mask.sum(axis=1).astype(jnp.int32) - 1
    node_angles = node_angles.at[jnp.arange(B), last].set(0.0)
    return node_angles


def _node_direct(X, E_idx):
    A_n, A_ca, A_c = X[:, :, 0], X[:, :, 1], X[:, :, 2]
    u = _normalize(A_n - A_ca)
    v = _normalize(A_ca - A_c)
    b = _normalize(u - v)
    n = _normalize(jnp.cross(u, v))
    local_frame = jnp.stack([b, n, jnp.cross(b, n)], axis=-1)   # [B, N, 3, 3]
    t = _normalize(X[:, :, (0, 2, 3, 4, 5)] - A_ca[:, :, None, :])
    node_direct = jnp.einsum('bnpm,bnmc->bnpc', t, local_frame)
    node_direct = node_direct.reshape(*node_direct.shape[:2], 15)
    X_neigh = _gather_neighbors(X, E_idx)                       # [B, N, K, 6, 3]
    t = _normalize(X_neigh - A_ca[:, :, None, None, :])
    edge_direct = jnp.einsum('bnkam,bnmc->bnkac', t, local_frame)
    edge_direct = edge_direct.reshape(*edge_direct.shape[:3], 18)
    return node_direct, edge_direct


def _node_rbf(X):
    rel0 = jnp.array([0, 0, 0, 0, 0, 1, 1, 1, 1, 2, 2, 2, 3, 3, 4])
    rel1 = jnp.array([1, 2, 3, 4, 5, 2, 3, 4, 5, 3, 4, 5, 4, 5, 5])
    D = jnp.linalg.norm(X[:, :, rel0] - X[:, :, rel1], axis=-1)  # [B, N, 15]
    return _rbf(D).reshape(*D.shape[:2], 15 * RBF_NUM)


def _edge_rbf(X, E_idx):
    X_neigh = _gather_neighbors(X, E_idx)                       # [B, N, K, 6, 3]
    CaX = X[:, :, 1]
    D = jnp.linalg.norm(X_neigh - CaX[:, :, None, None, :], axis=-1)  # [B,N,K,6]
    return _rbf(D).reshape(*D.shape[:3], 6 * RBF_NUM)


def _quaternions(R):
    diag = jnp.diagonal(R, axis1=-2, axis2=-1)
    Rxx, Ryy, Rzz = diag[..., 0], diag[..., 1], diag[..., 2]
    magnitudes = 0.5 * jnp.sqrt(jnp.abs(
        1 + jnp.stack([Rxx - Ryy - Rzz, -Rxx + Ryy - Rzz, -Rxx - Ryy + Rzz], -1)))
    signs = jnp.sign(jnp.stack([
        R[..., 2, 1] - R[..., 1, 2],
        R[..., 0, 2] - R[..., 2, 0],
        R[..., 1, 0] - R[..., 0, 1]], -1))
    xyz = signs * magnitudes
    w = jnp.sqrt(jax.nn.relu(1 + jnp.sum(diag, -1, keepdims=True))) / 2.0
    Q = jnp.concatenate([xyz, w], -1)
    return _normalize(Q, axis=-1)


def _edge_orientations(X, E_idx, eps=1e-6):
    # X: [B, N, 3]  (Ca coords); assumes N >= 4 (same as the reference).
    B, N = X.shape[0], X.shape[1]
    dX = X[:, 1:, :] - X[:, :-1, :]
    U = _normalize(dX)
    u_2, u_1 = U[:, :-2, :], U[:, 1:-1, :]
    n_2 = _normalize(jnp.cross(u_2, u_1))
    o_1 = _normalize(u_2 - u_1)
    O = jnp.stack([o_1, n_2, jnp.cross(o_1, n_2)], axis=2)      # [B, N-3, 3, 3]
    O = O.reshape(B, N - 3, 9)
    O = jnp.pad(O, ((0, 0), (1, 2), (0, 0)))                    # [B, N, 9]
    O_neighbors = _gather_neighbors(O, E_idx)                   # [B, N, K, 9]
    X_neighbors = _gather_neighbors(X, E_idx)                   # [B, N, K, 3]
    O = O.reshape(B, N, 3, 3)
    O_neighbors = O_neighbors.reshape(B, N, TOP_K, 3, 3)
    dX = X_neighbors - X[:, :, None, :]
    dU = jnp.einsum('bnij,bnkj->bnki', O, dX)
    dU = _normalize(dU)
    R = jnp.einsum('bnmi,bnkmj->bnkij', O, O_neighbors)
    Q = _quaternions(R)
    return jnp.concatenate([dU, Q], axis=-1)                    # [B, N, K, 7]


# ----------------------------------------------------------------------------
# Full forward pass
# ----------------------------------------------------------------------------
F_NODE = RBF_NUM * 15 + 27      # 267
F_EDGE = RBF_NUM * 6 + 25       # 121
_NODE_PAD = (-F_NODE) % 128     # 117  -> 384 total
_EDGE_PAD = (-F_EDGE) % 128     # 7    -> 128 total


def edge_feature(params, xyz, mask):
    B, N = xyz.shape[0], xyz.shape[1]
    CaX = xyz[:, :, 1]
    E_idx = _distance(CaX, mask)                                # [B, N, K]
    node_angle = _node_angle(xyz, mask)                         # [B, N, 12]
    node_dir, edge_dir = _node_direct(xyz, E_idx)               # [B,N,15], [B,N,K,18]
    node_rbf = _node_rbf(xyz)                                   # [B, N, 240]
    edge_rbf = _edge_rbf(xyz, E_idx)                            # [B, N, K, 96]
    edge_ori = _edge_orientations(CaX, E_idx)                   # [B, N, K, 7]

    # Concatenate directly into lane-aligned (multiple-of-128), compute-dtype
    # feature slabs.  The bf16 cast fuses into the producers / concat copy, so
    # the Pallas kernel reads half the HBM bytes and no extra pad/convert pass
    # over the slab is needed.  LN math inside the kernel stays f32.
    cd = COMPUTE_DTYPE
    geo_node_feat = jnp.concatenate(
        [node_dir.astype(cd), node_angle.astype(cd), node_rbf.astype(cd),
         jnp.zeros((B, N, _NODE_PAD), cd)], -1)                  # [B,N,384]
    geo_edge_feat = jnp.concatenate(
        [edge_dir.astype(cd), edge_ori.astype(cd), edge_rbf.astype(cd),
         jnp.zeros((B, N, TOP_K, _EDGE_PAD), cd)], -1)           # [B,N,K,128]

    # Hot path in Pallas: fused Linear + LayerNorm (lane-dense packed output).
    # TODO(synk): fuse node+edge into a single pallas_call for tiny B*N (two
    # launches + two weight DMAs dominate there; neutral for large inputs).
    node2d = geo_node_feat.reshape(B * N, geo_node_feat.shape[-1])
    edge2d = geo_edge_feat.reshape(B * N * TOP_K, geo_edge_feat.shape[-1])
    node = linear_layernorm(node2d, params['node_w'], params['node_b'],
                            params['node_g'], params['node_beta'],
                            block_pairs=512)
    edge = linear_layernorm(edge2d, params['edge_w'], params['edge_b'],
                            params['edge_g'], params['edge_beta'],
                            block_pairs=1024)
    node = node.reshape(B, N, NUM_HIDDEN)
    edge = edge.reshape(B, N, TOP_K, NUM_HIDDEN)
    return node, edge, E_idx


def init_params(key):
    ks = jax.random.split(key, 4)

    def linear_init(kw, kb, fan_in, fan_out):
        bound = 1.0 / jnp.sqrt(fan_in)
        w = jax.random.uniform(kw, (fan_in, fan_out), jnp.float32, -bound, bound)
        b = jax.random.uniform(kb, (fan_out,), jnp.float32, -bound, bound)
        return w, b

    node_w, node_b = linear_init(ks[0], ks[1], F_NODE, NUM_HIDDEN)
    edge_w, edge_b = linear_init(ks[2], ks[3], F_EDGE, NUM_HIDDEN)
    return dict(
        node_w=node_w, node_b=node_b,
        node_g=jnp.ones((NUM_HIDDEN,), jnp.float32),
        node_beta=jnp.zeros((NUM_HIDDEN,), jnp.float32),
        edge_w=edge_w, edge_b=edge_b,
        edge_g=jnp.ones((NUM_HIDDEN,), jnp.float32),
        edge_beta=jnp.zeros((NUM_HIDDEN,), jnp.float32),
    )


def _linear_ln_ref(x2d, w, b, g, beta):
    F = w.shape[0]
    y = x2d[:, :F] @ w + b
    mu = jnp.mean(y, axis=-1, keepdims=True)
    var = jnp.mean((y - mu) ** 2, axis=-1, keepdims=True)
    return (y - mu) * jax.lax.rsqrt(var + LN_EPS) * g + beta


if __name__ == "__main__":
    key = jax.random.PRNGKey(0)
    kx, kp = jax.random.split(key)
    B, N = 2, 16
    xyz = jax.random.normal(kx, (B, N, 6, 3), jnp.float32) * 3.0
    mask = jnp.ones((B, N), jnp.float32)
    mask = mask.at[1, -2:].set(0.0)
    params = init_params(kp)

    fwd = jax.jit(edge_feature)
    node, edge, e_idx = fwd(params, xyz, mask)
    jax.block_until_ready((node, edge, e_idx))

    assert node.shape == (B, N, NUM_HIDDEN)
    assert edge.shape == (B, N, TOP_K, NUM_HIDDEN)
    assert e_idx.shape == (B, N, TOP_K)
    assert bool(jnp.all(jnp.isfinite(node))) and bool(jnp.all(jnp.isfinite(edge)))

    # Numerical check of the fused Pallas Linear+LayerNorm against a pure-JAX
    # reference: f32 compute path (tight) and bf16 hot path (looser tolerance,
    # x and W are rounded to bf16 before the MXU).  R=37 also exercises the
    # odd-row and ragged-last-block paths.
    xr = jax.random.normal(jax.random.PRNGKey(1), (37, 384), jnp.float32)
    want = _linear_ln_ref(xr, params['node_w'], params['node_b'],
                          params['node_g'], params['node_beta'])
    got_f32 = linear_layernorm(xr, params['node_w'], params['node_b'],
                               params['node_g'], params['node_beta'],
                               compute_dtype=jnp.float32)
    assert jnp.allclose(got_f32, want, atol=2e-3, rtol=2e-3)
    got_bf16 = linear_layernorm(xr, params['node_w'], params['node_b'],
                                params['node_g'], params['node_beta'],
                                compute_dtype=jnp.bfloat16)
    assert jnp.allclose(got_bf16, want, atol=4e-2, rtol=4e-2)

    print("KERNEL_OK")
</pallas_src>

<mosaic_0001>
module attributes {stable_mosaic.version = 11 : i64} {
  func.func @_linear_ln_kernel(%arg0: i32, %arg1: memref<40x256xbf16, #tpu.memory_space<vmem>>, %arg2: memref<256x128xbf16, #tpu.memory_space<vmem>>, %arg3: memref<3x128xf32, #tpu.memory_space<vmem>>, %arg4: memref<128x128xf32, #tpu.memory_space<vmem>>, %arg5: memref<40x128xf32, #tpu.memory_space<vmem>>) attributes {dimension_semantics = [#tpu.dimension_semantics<parallel>], iteration_bounds = array<i64: 2>, scalar_prefetch = 0 : i64, scratch_operands = 0 : i64, tpu.core_type = #tpu.core_type<tc>, window_params = [{transform_indices = @transform_0, window_bounds = array<i64: 40, 256>}, {pipeline_mode = #tpu.pipeline_mode<synchronous>, transform_indices = @transform_1, window_bounds = array<i64: 256, 128>}, {pipeline_mode = #tpu.pipeline_mode<synchronous>, transform_indices = @transform_2, window_bounds = array<i64: 3, 128>}, {pipeline_mode = #tpu.pipeline_mode<synchronous>, transform_indices = @transform_3, window_bounds = array<i64: 128, 128>}, {transform_indices = @transform_4, window_bounds = array<i64: 40, 128>}]} {
    %c0 = arith.constant 0 : index
    %c0_0 = arith.constant 0 : index
    %0 = vector.load %arg1[%c0, %c0_0] : memref<40x256xbf16, #tpu.memory_space<vmem>>, vector<40x256xbf16>
    %c0_1 = arith.constant 0 : index
    %c0_2 = arith.constant 0 : index
    %1 = vector.load %arg2[%c0_1, %c0_2] : memref<256x128xbf16, #tpu.memory_space<vmem>>, vector<256x128xbf16>
    %c0_3 = arith.constant 0 : index
    %c0_4 = arith.constant 0 : index
    %2 = vector.load %arg3[%c0_3, %c0_4] : memref<3x128xf32, #tpu.memory_space<vmem>>, vector<3x128xf32>
    %c0_5 = arith.constant 0 : index
    %c0_6 = arith.constant 0 : index
    %3 = vector.load %arg4[%c0_5, %c0_6] : memref<128x128xf32, #tpu.memory_space<vmem>>, vector<128x128xf32>
    %cst = arith.constant dense<0.000000e+00> : vector<40x128xf32>
    %4 = tpu.matmul %0, %1, %cst {dimension_numbers = #tpu.dot_dimension_numbers<[1], [0], [0], [1], [0, 0, 1, 1], [], []>} : vector<40x256xbf16>, vector<256x128xbf16>, vector<40x128xf32> -> vector<40x128xf32>
    %5 = vector.extract_strided_slice %2 {offsets = [0, 0], sizes = [1, 128], strides = [1, 1]} : vector<3x128xf32> to vector<1x128xf32>
    %6 = vector.broadcast %5 : vector<1x128xf32> to vector<40x128xf32>
    %7 = arith.addf %4, %6 : vector<40x128xf32>
    %8 = arith.mulf %7, %7 : vector<40x128xf32>
    %cst_7 = arith.constant dense<0.000000e+00> : vector<40x128xf32>
    %9 = tpu.matmul %8, %3, %cst_7 {dimension_numbers = #tpu.dot_dimension_numbers<[1], [0], [0], [1], [0, 0, 1, 1], [], []>} : vector<40x128xf32>, vector<128x128xf32>, vector<40x128xf32> -> vector<40x128xf32>
    %cst_8 = arith.constant 9.99999974E-6 : f32
    %10 = vector.broadcast %cst_8 : f32 to vector<40x128xf32>
    %11 = arith.addf %9, %10 : vector<40x128xf32>
    %12 = math.rsqrt %11 : vector<40x128xf32>
    %13 = arith.mulf %7, %12 : vector<40x128xf32>
    %14 = vector.extract_strided_slice %2 {offsets = [1, 0], sizes = [1, 128], strides = [1, 1]} : vector<3x128xf32> to vector<1x128xf32>
    %15 = vector.broadcast %14 : vector<1x128xf32> to vector<40x128xf32>
    %16 = arith.mulf %13, %15 : vector<40x128xf32>
    %17 = vector.extract_strided_slice %2 {offsets = [2, 0], sizes = [1, 128], strides = [1, 1]} : vector<3x128xf32> to vector<1x128xf32>
    %18 = vector.broadcast %17 : vector<1x128xf32> to vector<40x128xf32>
    %19 = arith.addf %16, %18 : vector<40x128xf32>
    %c0_9 = arith.constant 0 : index
    %c0_10 = arith.constant 0 : index
    %20 = vector.load %arg5[%c0_9, %c0_10] : memref<40x128xf32, #tpu.memory_space<vmem>>, vector<40x128xf32>
    tpu.vector_store %arg5[%c0_9, %c0_10], %19 {strides = array<i32>} : memref<40x128xf32, #tpu.memory_space<vmem>>, vector<40x128xf32>,
    return
  }
  func.func @transform_0(%arg0: i32) -> (i32, i32) {
    %c0_i32 = arith.constant 0 : i32
    %c0_i32_0 = arith.constant 0 : i32
    return %arg0, %c0_i32 : i32, i32
  }
  func.func @transform_1(%arg0: i32) -> (i32, i32) {
    %c0_i32 = arith.constant 0 : i32
    %c0_i32_0 = arith.constant 0 : i32
    %c0_i32_1 = arith.constant 0 : i32
    return %c0_i32, %c0_i32_0 : i32, i32
  }
  func.func @transform_2(%arg0: i32) -> (i32, i32) {
    %c0_i32 = arith.constant 0 : i32
    %c0_i32_0 = arith.constant 0 : i32
    %c0_i32_1 = arith.constant 0 : i32
    return %c0_i32, %c0_i32_0 : i32, i32
  }
  func.func @transform_3(%arg0: i32) -> (i32, i32) {
    %c0_i32 = arith.constant 0 : i32
    %c0_i32_0 = arith.constant 0 : i32
    %c0_i32_1 = arith.constant 0 : i32
    return %c0_i32, %c0_i32_0 : i32, i32
  }
  func.func @transform_4(%arg0: i32) -> (i32, i32) {
    %c0_i32 = arith.constant 0 : i32
    %c0_i32_0 = arith.constant 0 : i32
    return %arg0, %c0_i32 : i32, i32
  }
}

module attributes {stable_mosaic.version = 11 : i64} {
  func.func @_linear_ln_kernel(%arg0: i32, %arg1: memref<8x768xbf16, #tpu.memory_space<vmem>>, %arg2: memref<768x128xbf16, #tpu.memory_space<vmem>>, %arg3: memref<3x128xf32, #tpu.memory_space<vmem>>, %arg4: memref<128x128xf32, #tpu.memory_space<vmem>>, %arg5: memref<8x128xf32, #tpu.memory_space<vmem>>) attributes {dimension_semantics = [#tpu.dimension_semantics<parallel>], iteration_bounds = array<i64: 2>, scalar_prefetch = 0 : i64, scratch_operands = 0 : i64, tpu.core_type = #tpu.core_type<tc>, window_params = [{transform_indices = @transform_0, window_bounds = array<i64: 8, 768>}, {pipeline_mode = #tpu.pipeline_mode<synchronous>, transform_indices = @transform_1, window_bounds = array<i64: 768, 128>}, {pipeline_mode = #tpu.pipeline_mode<synchronous>, transform_indices = @transform_2, window_bounds = array<i64: 3, 128>}, {pipeline_mode = #tpu.pipeline_mode<synchronous>, transform_indices = @transform_3, window_bounds = array<i64: 128, 128>}, {transform_indices = @transform_4, window_bounds = array<i64: 8, 128>}]} {
    %c0 = arith.constant 0 : index
    %c0_0 = arith.constant 0 : index
    %0 = vector.load %arg1[%c0, %c0_0] : memref<8x768xbf16, #tpu.memory_space<vmem>>, vector<8x768xbf16>
    %c0_1 = arith.constant 0 : index
    %c0_2 = arith.constant 0 : index
    %1 = vector.load %arg2[%c0_1, %c0_2] : memref<768x128xbf16, #tpu.memory_space<vmem>>, vector<768x128xbf16>
    %c0_3 = arith.constant 0 : index
    %c0_4 = arith.constant 0 : index
    %2 = vector.load %arg3[%c0_3, %c0_4] : memref<3x128xf32, #tpu.memory_space<vmem>>, vector<3x128xf32>
    %c0_5 = arith.constant 0 : index
    %c0_6 = arith.constant 0 : index
    %3 = vector.load %arg4[%c0_5, %c0_6] : memref<128x128xf32, #tpu.memory_space<vmem>>, vector<128x128xf32>
    %cst = arith.constant dense<0.000000e+00> : vector<8x128xf32>
    %4 = tpu.matmul %0, %1, %cst {dimension_numbers = #tpu.dot_dimension_numbers<[1], [0], [0], [1], [0, 0, 1, 1], [], []>} : vector<8x768xbf16>, vector<768x128xbf16>, vector<8x128xf32> -> vector<8x128xf32>
    %5 = vector.extract_strided_slice %2 {offsets = [0, 0], sizes = [1, 128], strides = [1, 1]} : vector<3x128xf32> to vector<1x128xf32>
    %6 = vector.broadcast %5 : vector<1x128xf32> to vector<8x128xf32>
    %7 = arith.addf %4, %6 : vector<8x128xf32>
    %8 = arith.mulf %7, %7 : vector<8x128xf32>
    %cst_7 = arith.constant dense<0.000000e+00> : vector<8x128xf32>
    %9 = tpu.matmul %8, %3, %cst_7 {dimension_numbers = #tpu.dot_dimension_numbers<[1], [0], [0], [1], [0, 0, 1, 1], [], []>} : vector<8x128xf32>, vector<128x128xf32>, vector<8x128xf32> -> vector<8x128xf32>
    %cst_8 = arith.constant 9.99999974E-6 : f32
    %10 = vector.broadcast %cst_8 : f32 to vector<8x128xf32>
    %11 = arith.addf %9, %10 : vector<8x128xf32>
    %12 = math.rsqrt %11 : vector<8x128xf32>
    %13 = arith.mulf %7, %12 : vector<8x128xf32>
    %14 = vector.extract_strided_slice %2 {offsets = [1, 0], sizes = [1, 128], strides = [1, 1]} : vector<3x128xf32> to vector<1x128xf32>
    %15 = vector.broadcast %14 : vector<1x128xf32> to vector<8x128xf32>
    %16 = arith.mulf %13, %15 : vector<8x128xf32>
    %17 = vector.extract_strided_slice %2 {offsets = [2, 0], sizes = [1, 128], strides = [1, 1]} : vector<3x128xf32> to vector<1x128xf32>
    %18 = vector.broadcast %17 : vector<1x128xf32> to vector<8x128xf32>
    %19 = arith.addf %16, %18 : vector<8x128xf32>
    %c0_9 = arith.constant 0 : index
    %c0_10 = arith.constant 0 : index
    %20 = vector.load %arg5[%c0_9, %c0_10] : memref<8x128xf32, #tpu.memory_space<vmem>>, vector<8x128xf32>
    tpu.vector_store %arg5[%c0_9, %c0_10], %19 {strides = array<i32>} : memref<8x128xf32, #tpu.memory_space<vmem>>, vector<8x128xf32>,
    return
  }
  func.func @transform_0(%arg0: i32) -> (i32, i32) {
    %c0_i32 = arith.constant 0 : i32
    %c0_i32_0 = arith.constant 0 : i32
    return %arg0, %c0_i32 : i32, i32
  }
  func.func @transform_1(%arg0: i32) -> (i32, i32) {
    %c0_i32 = arith.constant 0 : i32
    %c0_i32_0 = arith.constant 0 : i32
    %c0_i32_1 = arith.constant 0 : i32
    return %c0_i32, %c0_i32_0 : i32, i32
  }
  func.func @transform_2(%arg0: i32) -> (i32, i32) {
    %c0_i32 = arith.constant 0 : i32
    %c0_i32_0 = arith.constant 0 : i32
    %c0_i32_1 = arith.constant 0 : i32
    return %c0_i32, %c0_i32_0 : i32, i32
  }
  func.func @transform_3(%arg0: i32) -> (i32, i32) {
    %c0_i32 = arith.constant 0 : i32
    %c0_i32_0 = arith.constant 0 : i32
    %c0_i32_1 = arith.constant 0 : i32
    return %c0_i32, %c0_i32_0 : i32, i32
  }
  func.func @transform_4(%arg0: i32) -> (i32, i32) {
    %c0_i32 = arith.constant 0 : i32
    %c0_i32_0 = arith.constant 0 : i32
    return %arg0, %c0_i32 : i32, i32
  }
}

</mosaic_0001>

<bundles_post_ra>
// kernel: edge_feature.3
= control target key start
LH: loop header
LB: loop body
LE: loop exit
PB: predicated region body
PF: predicated region fallthrough
CT: control target
= control target key end

     0   :  { %s866_s15 = smov 0   ;;  %s1023_s0 = inlined_call_operand.vmem [shape: bf16[80,256], index: 0, kind: input, shape index: {}]   ;;  %s1024_s1 = inlined_call_operand.vmem [shape: bf16[256,128], index: 1, kind: input, shape index: {}]   ;;  %s1025_s2 = inlined_call_operand.vmem [shape: f32[3,128], index: 2, kind: input, shape index: {}]   ;;  %s1026_s3 = inlined_call_operand.vmem [shape: f32[128,128], index: 3, kind: input, shape index: {}]   ;;  %s1027_s4 = inlined_call_operand.vmem [shape: f32[80,128], index: 4, kind: output, shape index: {}]  }
   0x1 LB: > { %s626_s16 = sadd.s32 4294967295, %s836_s15   ;;  %p630_p0 = scmp.ge.s32.totalorder %s836_s15, 1  ;;  %s836_s15 = sphi %s866_s15, %s14_s15  }
   0x2   : > { %p164_p1 = scmp.lt.s32.totalorder %s836_s15, 3 }
   0x4   : > { %p165_p2 = pnand %p630_p0, %p164_p1 }
   0x5   : > { %v796_v0 = vld [vmem:[%s1024_s1 + $0x40] sm:$0xff] (!%p165_p2)   ;;  %s191_s19 = smul.u32 (!%p165_p2), 5, %s626_s16  ;;  %v798_v2 = vld [vmem:[%s1024_s1 + $0x48] sm:$0xff] (!%p165_p2)   ;;  %v838_v3 = vmov (!%p165_p2), 0.0|0.0   ;;  %v800_v5 = vld [vmem:[%s1024_s1 + $0x50] sm:$0xff] (!%p165_p2)   ;;  %v259_v42 = vlaneseq (!%p165_p2)  ;;  %vm839_vm0 = vmmov (!%p165_p2), 0  }
   0x6   : > { %168 = sbr.rel (%p165_p2) target bundleno = 505 (0x1f9), region = 36  ;;  %v797_v1 = vld [vmem:[%s1024_s1] sm:$0xff] (!%p165_p2)   ;;  %659 = vmatprep.subr.bf16.mxu0 (!%p165_p2), %v796_v0  ;;  %761 = vmatprep.subr.bf16.mxu1 (!%p165_p2), %v838_v3  ;;  %v799_v4 = vld [vmem:[%s1024_s1 + $0x8] sm:$0xff] (!%p165_p2)   ;;  %v801_v6 = vld [vmem:[%s1024_s1 + $0x10] sm:$0xff] (!%p165_p2)   ;;  %v840_v55 = vmov (!%p165_p2), 0.0  }
   0x7   : > { %660 = vmatpush3.bf16.msra.mxu0 (!%p165_p2), %v797_v1  ;;  %p192_p3 = scmp.lt.s32.totalorder (!%p165_p2), %s191_s19, 9  ;;  %v802_v7 = vld [vmem:[%s1024_s1 + $0x58] sm:$0xff] (!%p165_p2)   ;;  %v804_v9 = vld [vmem:[%s1024_s1 + $0x60] sm:$0xff] (!%p165_p2)   ;;  %v806_v11 = vld [vmem:[%s1024_s1 + $0x68] sm:$0xff] (!%p165_p2)   ;;  %v260_v46 = vshrl.u32 (!%p165_p2), %v259_v42, 7  ;;  %746 = vmatprep.mubr.msk.f32.mxu1 (!%p165_p2), %vm839_vm0, %v840_v55 }
   0x8   : > { %661 = vmatprep.subr.bf16.mxu0 (!%p165_p2), %v798_v2  ;;  %v803_v8 = vld [vmem:[%s1024_s1 + $0x18] sm:$0xff] (!%p165_p2)   ;;  %v805_v10 = vld [vmem:[%s1024_s1 + $0x20] sm:$0xff] (!%p165_p2)   ;;  %v807_v13 = vld [vmem:[%s1024_s1 + $0x28] sm:$0xff] (!%p165_p2)  }
   0x9   : > { %v243_v14 = vld [vmem:[%s1026_s3] sm:$0xff] (!%p165_p2)  ;;  %v244_v15 = vld [vmem:[%s1026_s3 + $0x8] sm:$0xff] (!%p165_p2)  ;;  %v245_v16 = vld [vmem:[%s1026_s3 + $0x10] sm:$0xff] (!%p165_p2)  ;;  %v549_v50 = vsub.s32 (!%p165_p2), 1, %v260_v46  ;;  %v558_v51 = vsub.s32 (!%p165_p2), 2, %v260_v46  ;;  %v261_v56 = vsub.s32 (!%p165_p2), 0, %v260_v46 }
   0xa   : > { %v808_v17 = vld [vmem:[%s1024_s1 + $0x70] sm:$0xff] (!%p165_p2)   ;;  %v762_v18 = vpack.c.bf16 (!%p165_p2), %v244_v15, %v243_v14  ;;  %v246_v19 = vld [vmem:[%s1026_s3 + $0x18] sm:$0xff] (!%p165_p2)  ;;  %v247_v22 = vld [vmem:[%s1026_s3 + $0x20] sm:$0xff] (!%p165_p2) }
   0xb   : > { %662 = vmatpush3.bf16.msra.mxu0 (!%p165_p2), %v799_v4  ;;  %v765_v20 = vpack.c.bf16 (!%p165_p2), %v246_v19, %v245_v16  ;;  %v809_v21 = vld [vmem:[%s1024_s1 + $0x30] sm:$0xff] (!%p165_p2)   ;;  %v248_v23 = vld [vmem:[%s1026_s3 + $0x28] sm:$0xff] (!%p165_p2)  ;;  %v810_v24 = vld [vmem:[%s1024_s1 + $0x78] sm:$0xff] (!%p165_p2)  }
   0xc   : > { %663 = vmatprep.subr.bf16.mxu0 (!%p165_p2), %v800_v5  ;;  %763 = vmatpush3.bf16.msra.mxu1 (!%p165_p2), %v762_v18  ;;  %v768_v25 = vpack.c.bf16 (!%p165_p2), %v248_v23, %v247_v22  ;;  %v811_v26 = vld [vmem:[%s1024_s1 + $0x38] sm:$0xff] (!%p165_p2)   ;;  %v249_v27 = vld [vmem:[%s1026_s3 + $0x30] sm:$0xff] (!%p165_p2)  ;;  %v251_v32 = vld [vmem:[%s1026_s3 + $0x40] sm:$0xff] (!%p165_p2) }
   0xd   : > { %s1029_s19 = smov (!%p192_p3, %s191_s19), 9  ;;  %764 = vmatprep.subr.bf16.mxu1 %v838_v3  ;;  %v250_v28 = vld [vmem:[%s1026_s3 + $0x38] sm:$0xff]  ;;  %v252_v33 = vld [vmem:[%s1026_s3 + $0x48] sm:$0xff]  ;;  %v253_v35 = vld [vmem:[%s1026_s3 + $0x50] sm:$0xff] }
   0xe   : > { %s658_s8 = sshll.u32 %s1029_s19, 3  ;;  %v771_v30 = vpack.c.bf16 %v250_v28, %v249_v27  ;;  %v774_v34 = vpack.c.bf16 %v252_v33, %v251_v32  ;;  %v254_v36 = vld [vmem:[%s1026_s3 + $0x58] sm:$0xff]  ;;  %v255_v43 = vld [vmem:[%s1026_s3 + $0x60] sm:$0xff]  ;;  %v256_v44 = vld [vmem:[%s1026_s3 + $0x68] sm:$0xff] }
   0xf   : > { %664 = vmatpush3.bf16.msra.mxu0 %v801_v6  ;;  %s910_s13 = scalar_lea.vmem %s1023_s0, %s658_s8  ;;  %v777_v39 = vpack.c.bf16 %v254_v36, %v253_v35  ;;  %v780_v45 = vpack.c.bf16 %v256_v44, %v255_v43  ;;  %v257_v47 = vld [vmem:[%s1026_s3 + $0x70] sm:$0xff]  ;;  %v258_v48 = vld [vmem:[%s1026_s3 + $0x78] sm:$0xff]  ;;  %v242_v52 = vld [vmem:[%s1025_s2] sm:$0x7]  ;;  %s202_s21 = scalar_lea.vmem %s1027_s4, %s658_s8 }
  0x10   : > { %665 = vmatprep.subr.bf16.mxu0 %v802_v7  ;;  %v814_v12 = vld [vmem:[%s910_s13 + $0x4] ss:$8 sps:$4 sm:$0xff]   ;;  %766 = vmatpush3.bf16.msra.mxu1 %v765_v20  ;;  %v812_v29 = vld [vmem:[%s910_s13] ss:$8 sps:$4 sm:$0xff]   ;;  %v815_v31 = vld [vmem:[%s910_s13 + $0x14] ss:$8 sps:$4 sm:$0xff]   ;;  %v783_v49 = vpack.c.bf16 %v258_v48, %v257_v47  ;;  %v996_v53 = vrot.slane %v242_v52, %v549_v50  ;;  %v998_v54 = vrot.slane %v242_v52, %v558_v51 }
  0x11   : > { %418 = vmatprep.mubr.bf16.mxu0 %v814_v12  ;;  %767 = vmatprep.subr.bf16.mxu1 %v838_v3  ;;  %v209_v37 = vld [vmem:[%s910_s13 + $0x20] sm:$0xff]  ;;  %v817_v38 = vld [vmem:[%s910_s13 + $0x10] ss:$8 sps:$4 sm:$0xff]   ;;  %v262_v58 = vrot.slane %v242_v52, %v261_v56 }
  0x12   : > { %v639_v40 = vcombine.high %v209_v37, %v209_v37  ;;  %v638_v41 = vcombine.low %v209_v37, %v209_v37 }
  0x13   : > { %666 = vmatpush3.bf16.msra.mxu0 %v803_v8 }
  0x14   : > { %667 = vmatprep.subr.bf16.mxu0 %v804_v9  ;;  %769 = vmatpush3.bf16.msra.mxu1 %v768_v25 }
  0x15   : > { %770 = vmatprep.subr.bf16.mxu1 %v838_v3 }
  0x17   : > { %668 = vmatpush3.bf16.msra.mxu0 %v805_v10 }
  0x18   : > { %669 = vmatprep.subr.bf16.mxu0 %v806_v11  ;;  %772 = vmatpush3.bf16.msra.mxu1 %v771_v30 }
  0x19   : > { %773 = vmatprep.subr.bf16.mxu1 %v838_v3 }
  0x1b   : > { %670 = vmatpush3.bf16.msra.mxu0 %v807_v13 }
  0x1c   : > { %671 = vmatprep.subr.bf16.mxu0 %v808_v17  ;;  %775 = vmatpush3.bf16.msra.mxu1 %v774_v34 }
  0x1d   : > { %776 = vmatprep.subr.bf16.mxu1 %v838_v3 }
  0x1f   : > { %672 = vmatpush3.bf16.msra.mxu0 %v809_v21 }
  0x20   : > { %673 = vmatprep.subr.bf16.mxu0 %v810_v24  ;;  %778 = vmatpush3.bf16.msra.mxu1 %v777_v39 }
  0x21   : > { %779 = vmatprep.subr.bf16.mxu1 %v838_v3 }
  0x23   : > { %674 = vmatpush3.bf16.msra.mxu0 %v811_v26 }
  0x24   : > { %781 = vmatpush3.bf16.msra.mxu1 %v780_v45 }
  0x25   : > { %782 = vmatprep.subr.bf16.mxu1 %v838_v3 }
  0x26   : > { %419 = vmatmul.mubr.bf16.vlgmr.msra.gmra.mrb[0].mxu0 %v812_v29 }
  0x27   : > { %426 = vmatprep.mubr.bf16.mxu0 %v815_v31 }
  0x28   : > { %784 = vmatpush3.bf16.msra.mxu1 %v783_v49 }
  0x2e   : > { %427 = vmatmul.mubr.bf16.gmra.mrb[4].mxu0 %v817_v38 }
  0x2f   : > { %434 = vmatprep.mubr.bf16.mxu0 %v639_v40 }
  0x36   : > { %435 = vmatmul.mubr.bf16.gmra.mrb[8].mxu0 %v638_v41 }
  0xf9   : > { %v675_v57 = vpop.f32.mrb[0].mxu0 }
  0xfa   : > { %v676_v59 = vpop.f32.mrb[1].mxu0 }
  0xfb   : > { %v677_v60 = vadd.f32 %v676_v59, %v675_v57  ;;  %v678_v61 = vpop.f32.mrb[2].mxu0 }
  0xfc   : > { %v679_v62 = vpop.f32.mrb[3].mxu0 }
  0xfd   : > { %v421_v63 = vadd.f32 %v677_v60, %v262_v58  ;;  %v680_v0 = vadd.f32 %v679_v62, %v678_v61 }
  0xff   : > { %v424_v1 = vadd.f32 %v680_v0, %v262_v58  ;;  %v442_v2 = vmul.f32 %v421_v63, %v421_v63 }
 0x101   : > { %v681_v3 = vpop.f32.mrb[4].mxu0  ;;  %747 = vmatmul.mubr.f32.vlgmr.msra.gmra.mrb[0].mxu1 %v442_v2  ;;  %v443_v7 = vmul.f32 %v424_v1, %v424_v1 }
 0x102   : > { %v682_v4 = vpop.f32.mrb[5].mxu0  ;;  %749 = vmatprep.mubr.msk.f32.mxu1 %vm839_vm0, %v840_v55 }
 0x103   : > { %v683_v5 = vadd.f32 %v682_v4, %v681_v3  ;;  %v684_v6 = vpop.f32.mrb[6].mxu0 }
 0x104   : > { %v685_v8 = vpop.f32.mrb[7].mxu0 }
 0x105   : > { %v429_v9 = vadd.f32 %v683_v5, %v262_v58  ;;  %v686_v10 = vadd.f32 %v685_v8, %v684_v6  ;;  %750 = vmatmul.mubr.f32.gmra.mrb[2].mxu1 %v443_v7 }
 0x106   : > { %752 = vmatprep.mubr.msk.f32.mxu1 %vm839_vm0, %v840_v55 }
 0x107   : > { %v432_v11 = vadd.f32 %v686_v10, %v262_v58  ;;  %v444_v12 = vmul.f32 %v429_v9, %v429_v9 }
 0x109   : > { %v687_v13 = vpop.f32.mrb[8].mxu0  ;;  %753 = vmatmul.mubr.f32.gmra.mrb[4].mxu1 %v444_v12  ;;  %v445_v17 = vmul.f32 %v432_v11, %v432_v11 }
 0x10a   : > { %v688_v14 = vpop.f32.mrb[9].mxu0  ;;  %755 = vmatprep.mubr.msk.f32.mxu1 %vm839_vm0, %v840_v55 }
 0x10b   : > { %v689_v15 = vadd.f32 %v688_v14, %v687_v13  ;;  %v690_v16 = vpop.f32.mrb[10].mxu0 }
 0x10c   : > { %v691_v18 = vpop.f32.mrb[11].mxu0 }
 0x10d   : > { %v437_v19 = vadd.f32 %v689_v15, %v262_v58  ;;  %756 = vmatmul.mubr.f32.gmra.mrb[6].mxu1 %v445_v17 }
 0x10e   : > { %758 = vmatprep.mubr.msk.f32.mxu1 %vm839_vm0, %v840_v55 }
 0x10f   : > { %v446_v20 = vmul.f32 %v437_v19, %v437_v19 }
 0x111   : > { %759 = vmatmul.mubr.f32.gmra.mrb[8].mxu1 %v446_v20 }
 0x1d4   : > { %v513_v21 = vpop.f32.mrb[0].mxu1 }
 0x1d5   : > { %v514_v22 = vadd.f32 1e-05, %v513_v21  ;;  %v748_v23 = vpop.f32.mrb[1].mxu1 }
 0x1d7   : > { %820 = vrsqrt.f32 %v514_v22 }
 0x1d8   : > { %v518_v24 = vpop.f32.mrb[2].mxu1 }
 0x1d9   : > { %v519_v25 = vadd.f32 1e-05, %v518_v24  ;;  %v751_v26 = vpop.f32.mrb[3].mxu1 }
 0x1db   : > { %822 = vrsqrt.f32 %v519_v25 }
 0x1dc   : > { %v523_v27 = vpop.f32.mrb[4].mxu1 }
 0x1dd   : > { %v524_v28 = vadd.f32 1e-05, %v523_v27  ;;  %v754_v29 = vpop.f32.mrb[5].mxu1 }
 0x1df   : > { %824 = vrsqrt.f32 %v524_v28 }
 0x1e0   : > { %v528_v30 = vpop.f32.mrb[6].mxu1 }
 0x1e1   : > { %v821_v31 = vpop.eup %820  ;;  %v529_v32 = vadd.f32 1e-05, %v528_v30  ;;  %v757_v33 = vpop.f32.mrb[7].mxu1 }
 0x1e2   : > { %v542_v34 = vmul.f32 %v821_v31, %v421_v63 }
 0x1e3   : > { %826 = vrsqrt.f32 %v529_v32 }
 0x1e4   : > { %v551_v35 = vmul.f32 %v996_v53, %v542_v34  ;;  %v533_v36 = vpop.f32.mrb[8].mxu1 }
 0x1e5   : > { %v823_v37 = vpop.eup %822  ;;  %v534_v38 = vadd.f32 1e-05, %v533_v36  ;;  %v760_v39 = vpop.f32.mrb[9].mxu1 }
 0x1e6   : > { %v560_v40 = vadd.f32 %v998_v54, %v551_v35  ;;  %v543_v41 = vmul.f32 %v823_v37, %v424_v1 }
 0x1e7   : > { %828 = vrsqrt.f32 %v534_v38 }
 0x1e8   : > { %565 = vst [vmem:[%s202_s21] sm:$0xff] %v560_v40  ;;  %v552_v42 = vmul.f32 %v996_v53, %v543_v41 }
 0x1e9   : > { %v825_v43 = vpop.eup %824 }
 0x1ea   : > { %v561_v44 = vadd.f32 %v998_v54, %v552_v42  ;;  %v544_v45 = vmul.f32 %v825_v43, %v429_v9 }
 0x1ec   : > { %566 = vst [vmem:[%s202_s21 + $0x8] sm:$0xff] %v561_v44  ;;  %v553_v46 = vmul.f32 %v996_v53, %v544_v45 }
 0x1ed   : > { %v827_v47 = vpop.eup %826 }
 0x1ee   : > { %v562_v48 = vadd.f32 %v998_v54, %v553_v46  ;;  %v545_v49 = vmul.f32 %v827_v47, %v432_v11 }
 0x1f0   : > { %567 = vst [vmem:[%s202_s21 + $0x10] sm:$0xff] %v562_v48  ;;  %v554_v50 = vmul.f32 %v996_v53, %v545_v49 }
 0x1f1   : > { %v829_v51 = vpop.eup %828 }
 0x1f2   : > { %v563_v52 = vadd.f32 %v998_v54, %v554_v50  ;;  %v546_v55 = vmul.f32 %v829_v51, %v437_v19 }
 0x1f4   : > { %568 = vst [vmem:[%s202_s21 + $0x18] sm:$0xff] %v563_v52  ;;  %v555_v56 = vmul.f32 %v996_v53, %v546_v55 }
 0x1f6   : > { %v564_v57 = vadd.f32 %v998_v54, %v555_v56 }
 0x1f8   : > { %569 = vst [vmem:[%s202_s21 + $0x20] sm:$0xff] %v564_v57 }
 0x1f9 PF: > { %s14_s15 = sadd.s32 1, %s836_s15  }
 0x1fa   : > { %p11_p4 = scmp.ge.s32.totalorder %s14_s15, 4  }
 0x1fc   :  { %13 = sbr.rel (!%p11_p4) target bundleno = 1 (0x1), region = 66 }

// kernel: edge_feature.2
= control target key start
LH: loop header
LB: loop body
LE: loop exit
PB: predicated region body
PF: predicated region fallthrough
CT: control target
= control target key end

     0   :  { %s1192_s15 = smov 0   ;;  %s1423_s0 = inlined_call_operand.vmem [shape: bf16[16,768], index: 0, kind: input, shape index: {}]   ;;  %s1424_s1 = inlined_call_operand.vmem [shape: bf16[768,128], index: 1, kind: input, shape index: {}]   ;;  %s1425_s2 = inlined_call_operand.vmem [shape: f32[3,128], index: 2, kind: input, shape index: {}]   ;;  %s1426_s3 = inlined_call_operand.vmem [shape: f32[128,128], index: 3, kind: input, shape index: {}]   ;;  %s1427_s4 = inlined_call_operand.vmem [shape: f32[16,128], index: 4, kind: output, shape index: {}]  }
   0x1 LB: > { %s883_s16 = sadd.s32 4294967295, %s1162_s15   ;;  %p887_p0 = scmp.ge.s32.totalorder %s1162_s15, 1  ;;  %s1162_s15 = sphi %s1192_s15, %s14_s15  }
   0x2   : > { %p162_p1 = scmp.lt.s32.totalorder %s1162_s15, 3 }
   0x4   : > { %p163_p2 = pnand %p887_p0, %p162_p1 }
   0x5   : > { %v1100_v0 = vld [vmem:[%s1424_s1 + $0x40] sm:$0xff] (!%p163_p2)   ;;  %v1104_v4 = vld [vmem:[%s1424_s1 + $0x48] sm:$0xff] (!%p163_p2)   ;;  %v1108_v8 = vld [vmem:[%s1424_s1 + $0x50] sm:$0xff] (!%p163_p2)   ;;  %p187_p3 = scmp.lt.s32.totalorder (!%p163_p2), %s883_s16, 1  ;;  %v313_v57 = vlaneseq (!%p163_p2)  ;;  %vm1165_vm0 = vmmov (!%p163_p2), 0  }
   0x6   : > { %166 = sbr.rel (%p163_p2) target bundleno = 521 (0x209), region = 36  ;;  %v1101_v1 = vld [vmem:[%s1424_s1] sm:$0xff] (!%p163_p2)   ;;  %946 = vmatprep.subr.bf16.mxu0 (!%p163_p2), %v1100_v0  ;;  %v1105_v5 = vld [vmem:[%s1424_s1 + $0x8] sm:$0xff] (!%p163_p2)   ;;  %v1109_v9 = vld [vmem:[%s1424_s1 + $0x10] sm:$0xff] (!%p163_p2)  }
   0x7   : > { %v1102_v2 = vld [vmem:[%s1424_s1 + $0xc0] sm:$0xff] (!%p163_p2)   ;;  %947 = vmatpush3.bf16.msra.mxu0 (!%p163_p2), %v1101_v1  ;;  %v1106_v6 = vld [vmem:[%s1424_s1 + $0xc8] sm:$0xff] (!%p163_p2)   ;;  %v1110_v10 = vld [vmem:[%s1424_s1 + $0xd0] sm:$0xff] (!%p163_p2)   ;;  %v314_v58 = vshrl.u32 (!%p163_p2), %v313_v57, 7 }
   0x8   : > { %v1103_v3 = vld [vmem:[%s1424_s1 + $0x80] sm:$0xff] (!%p163_p2)   ;;  %968 = vmatprep.subr.bf16.mxu1 (!%p163_p2), %v1102_v2  ;;  %948 = vmatprep.subr.bf16.mxu0 (!%p163_p2), %v1104_v4  ;;  %v1107_v7 = vld [vmem:[%s1424_s1 + $0x88] sm:$0xff] (!%p163_p2)   ;;  %v1111_v11 = vld [vmem:[%s1424_s1 + $0x90] sm:$0xff] (!%p163_p2)  }
   0x9   : > { %969 = vmatpush3.bf16.msra.mxu1 (!%p163_p2), %v1103_v3  ;;  %v1112_v12 = vld [vmem:[%s1424_s1 + $0x58] sm:$0xff] (!%p163_p2)   ;;  %v1116_v16 = vld [vmem:[%s1424_s1 + $0x60] sm:$0xff] (!%p163_p2)   ;;  %v1120_v20 = vld [vmem:[%s1424_s1 + $0x68] sm:$0xff] (!%p163_p2)   ;;  %v821_v59 = vsub.s32 (!%p163_p2), 1, %v314_v58  ;;  %v826_v60 = vsub.s32 (!%p163_p2), 2, %v314_v58  ;;  %v1164_v3 = vmov (!%p163_p2), 0.0|0.0  }
   0xa   : > { %970 = vmatprep.subr.bf16.mxu1 (!%p163_p2), %v1106_v6  ;;  %v1113_v13 = vld [vmem:[%s1424_s1 + $0x18] sm:$0xff] (!%p163_p2)   ;;  %v1117_v17 = vld [vmem:[%s1424_s1 + $0x20] sm:$0xff] (!%p163_p2)   ;;  %v1121_v21 = vld [vmem:[%s1424_s1 + $0x28] sm:$0xff] (!%p163_p2)  }
   0xb   : > { %949 = vmatpush3.bf16.msra.mxu0 (!%p163_p2), %v1105_v5  ;;  %v1114_v14 = vld [vmem:[%s1424_s1 + $0xd8] sm:$0xff] (!%p163_p2)   ;;  %v1118_v18 = vld [vmem:[%s1424_s1 + $0xe0] sm:$0xff] (!%p163_p2)   ;;  %v1122_v22 = vld [vmem:[%s1424_s1 + $0xe8] sm:$0xff] (!%p163_p2)  }
   0xc   : > { %950 = vmatprep.subr.bf16.mxu0 (!%p163_p2), %v1108_v8  ;;  %v1115_v15 = vld [vmem:[%s1424_s1 + $0x98] sm:$0xff] (!%p163_p2)   ;;  %v1119_v19 = vld [vmem:[%s1424_s1 + $0xa0] sm:$0xff] (!%p163_p2)   ;;  %v1123_v23 = vld [vmem:[%s1424_s1 + $0xa8] sm:$0xff] (!%p163_p2)  }
   0xd   : > { %971 = vmatpush3.bf16.msra.mxu1 %v1107_v7  ;;  %s1429_s16 = smov (!%p187_p3, %s883_s16), 1  ;;  %v1124_v24 = vld [vmem:[%s1424_s1 + $0x70] sm:$0xff]   ;;  %v1128_v28 = vld [vmem:[%s1424_s1 + $0x78] sm:$0xff]   ;;  %v1134_v35 = vld [vmem:[%s1424_s1 + $0x140] sm:$0xff]  }
   0xe   : > { %972 = vmatprep.subr.bf16.mxu1 %v1110_v10  ;;  %s1088_s19 = smul.u32 24, %s1429_s16  ;;  %v1125_v25 = vld [vmem:[%s1424_s1 + $0x30] sm:$0xff]   ;;  %v1129_v29 = vld [vmem:[%s1424_s1 + $0x38] sm:$0xff]   ;;  %v1137_v39 = vld [vmem:[%s1424_s1 + $0x100] sm:$0xff]   ;;  %s889_s6 = sshll.u32 %s1429_s16, 3 }
   0xf   : > { %951 = vmatpush3.bf16.msra.mxu0 %v1109_v9  ;;  %v1126_v26 = vld [vmem:[%s1424_s1 + $0xf0] sm:$0xff]   ;;  %v1130_v30 = vld [vmem:[%s1424_s1 + $0xf8] sm:$0xff]   ;;  %v1138_v40 = vld [vmem:[%s1424_s1 + $0x148] sm:$0xff]   ;;  %s195_s9 = scalar_lea.vmem %s1427_s4, %s889_s6 }
  0x10   : > { %952 = vmatprep.subr.bf16.mxu0 %v1112_v12  ;;  %v1127_v27 = vld [vmem:[%s1424_s1 + $0xb0] sm:$0xff]   ;;  %s1297_s30 = scalar_lea.vmem %s1423_s0, %s1088_s19  ;;  %v1133_v34 = vld [vmem:[%s1424_s1 + $0xb8] sm:$0xff]   ;;  %v1139_v41 = vld [vmem:[%s1424_s1 + $0x108] sm:$0xff]  }
  0x11   : > { %973 = vmatpush3.bf16.msra.mxu1 %v1111_v11  ;;  %v197_v31 = vld [vmem:[%s1297_s30] sm:$0xff]  ;;  %v198_v36 = vld [vmem:[%s1297_s30 + $0x8] sm:$0xff]  ;;  %v1140_v42 = vld [vmem:[%s1424_s1 + $0x150] sm:$0xff]  }
  0x12   : > { %974 = vmatprep.subr.bf16.mxu1 %v1114_v14  ;;  %v890_v32 = vcombine.low %v197_v31, %v197_v31  ;;  %v891_v33 = vcombine.high %v197_v31, %v197_v31  ;;  %v892_v37 = vcombine.low %v198_v36, %v198_v36  ;;  %v893_v38 = vcombine.high %v198_v36, %v198_v36  ;;  %v1141_v43 = vld [vmem:[%s1424_s1 + $0x110] sm:$0xff]   ;;  %v1142_v44 = vld [vmem:[%s1424_s1 + $0x158] sm:$0xff]   ;;  %v1144_v46 = vld [vmem:[%s1424_s1 + $0x160] sm:$0xff]  }
  0x13   : > { %953 = vmatpush3.bf16.msra.mxu0 %v1113_v13  ;;  %v1143_v45 = vld [vmem:[%s1424_s1 + $0x118] sm:$0xff]   ;;  %v1145_v47 = vld [vmem:[%s1424_s1 + $0x120] sm:$0xff]   ;;  %v199_v48 = vld [vmem:[%s1297_s30 + $0x10] sm:$0xff] }
  0x14   : > { %954 = vmatprep.subr.bf16.mxu0 %v1116_v16  ;;  %658 = vmatprep.mubr.bf16.mxu0 %v891_v33  ;;  %v1146_v49 = vld [vmem:[%s1424_s1 + $0x168] sm:$0xff]   ;;  %v895_v50 = vcombine.high %v199_v48, %v199_v48  ;;  %v1148_v52 = vld [vmem:[%s1424_s1 + $0x170] sm:$0xff]   ;;  %v1150_v54 = vld [vmem:[%s1424_s1 + $0x178] sm:$0xff]   ;;  %v894_v56 = vcombine.low %v199_v48, %v199_v48 }
  0x15   : > { %975 = vmatpush3.bf16.msra.mxu1 %v1115_v15  ;;  %698 = vmatprep.mubr.bf16.mxu1 %v893_v38  ;;  %v1147_v51 = vld [vmem:[%s1424_s1 + $0x128] sm:$0xff]   ;;  %v1149_v53 = vld [vmem:[%s1424_s1 + $0x130] sm:$0xff]   ;;  %v1151_v55 = vld [vmem:[%s1424_s1 + $0x138] sm:$0xff]  }
  0x16   : > { %976 = vmatprep.subr.bf16.mxu1 %v1118_v18  ;;  %v296_v61 = vld [vmem:[%s1425_s2] sm:$0x7]  ;;  %v298_v1 = vld [vmem:[%s1426_s3 + $0x8] sm:$0xff]  ;;  %v299_v2 = vld [vmem:[%s1426_s3 + $0x10] sm:$0xff] }
  0x17   : > { %955 = vmatpush3.bf16.msra.mxu0 %v1117_v17  ;;  %v1362_v62 = vrot.slane %v296_v61, %v821_v59  ;;  %v1364_v63 = vrot.slane %v296_v61, %v826_v60  ;;  %v297_v0 = vld [vmem:[%s1426_s3] sm:$0xff]  ;;  %v300_v5 = vld [vmem:[%s1426_s3 + $0x18] sm:$0xff]  ;;  %v302_v8 = vld [vmem:[%s1426_s3 + $0x28] sm:$0xff] }
  0x18   : > { %956 = vmatprep.subr.bf16.mxu0 %v1120_v20  ;;  %v1065_v4 = vpack.c.bf16 %v298_v1, %v297_v0  ;;  %v1068_v6 = vpack.c.bf16 %v300_v5, %v299_v2  ;;  %v301_v7 = vld [vmem:[%s1426_s3 + $0x20] sm:$0xff]  ;;  %v303_v10 = vld [vmem:[%s1426_s3 + $0x30] sm:$0xff]  ;;  %v304_v11 = vld [vmem:[%s1426_s3 + $0x38] sm:$0xff] }
  0x19   : > { %977 = vmatpush3.bf16.msra.mxu1 %v1119_v19  ;;  %v1071_v9 = vpack.c.bf16 %v302_v8, %v301_v7  ;;  %v1074_v12 = vpack.c.bf16 %v304_v11, %v303_v10  ;;  %v305_v13 = vld [vmem:[%s1426_s3 + $0x40] sm:$0xff]  ;;  %v306_v14 = vld [vmem:[%s1426_s3 + $0x48] sm:$0xff]  ;;  %v307_v16 = vld [vmem:[%s1426_s3 + $0x50] sm:$0xff] }
  0x1a   : > { %978 = vmatprep.subr.bf16.mxu1 %v1122_v22  ;;  %v1077_v15 = vpack.c.bf16 %v306_v14, %v305_v13  ;;  %v308_v17 = vld [vmem:[%s1426_s3 + $0x58] sm:$0xff]  ;;  %v309_v19 = vld [vmem:[%s1426_s3 + $0x60] sm:$0xff]  ;;  %v310_v20 = vld [vmem:[%s1426_s3 + $0x68] sm:$0xff] }
  0x1b   : > { %957 = vmatpush3.bf16.msra.mxu0 %v1121_v21  ;;  %v1080_v18 = vpack.c.bf16 %v308_v17, %v307_v16  ;;  %v1083_v21 = vpack.c.bf16 %v310_v20, %v309_v19  ;;  %v311_v22 = vld [vmem:[%s1426_s3 + $0x70] sm:$0xff] }
  0x1c   : > { %958 = vmatprep.subr.bf16.mxu0 %v1124_v24 }
  0x1d   : > { %979 = vmatpush3.bf16.msra.mxu1 %v1123_v23  ;;  %v312_v23 = vld [vmem:[%s1426_s3 + $0x78] sm:$0xff] }
  0x1e   : > { %980 = vmatprep.subr.bf16.mxu1 %v1126_v26  ;;  %v1086_v24 = vpack.c.bf16 %v312_v23, %v311_v22  ;;  %v315_v26 = vsub.s32 0, %v314_v58 }
  0x1f   : > { %959 = vmatpush3.bf16.msra.mxu0 %v1125_v25  ;;  %v1166_v25 = vmov 0.0  }
  0x20   : > { %960 = vmatprep.subr.bf16.mxu0 %v1128_v28  ;;  %v316_v28 = vrot.slane %v296_v61, %v315_v26 }
  0x21   : > { %981 = vmatpush3.bf16.msra.mxu1 %v1127_v27 }
  0x22   : > { %982 = vmatprep.subr.bf16.mxu1 %v1130_v30 }
  0x23   : > { %961 = vmatpush3.bf16.msra.mxu0 %v1129_v29 }
  0x24   : > { %990 = vmatprep.subr.bf16.mxu0 %v1134_v35 }
  0x25   : > { %983 = vmatpush3.bf16.msra.mxu1 %v1133_v34 }
  0x26   : > { %659 = vmatmul.mubr.bf16.vlgmr.msra.gmra.mrb[0].mxu0 %v890_v32  ;;  %1064 = vmatprep.subr.bf16.mxu1 %v1164_v3 }
  0x27   : > { %991 = vmatpush3.bf16.msra.mxu0 %v1137_v39  ;;  %738 = vmatprep.mubr.bf16.mxu0 %v895_v50 }
  0x28   : > { %699 = vmatmul.mubr.bf16.vlgmr.msra.gmra.mrb[0].mxu1 %v892_v37  ;;  %992 = vmatprep.subr.bf16.mxu0 %v1138_v40 }
  0x29   : > { %1066 = vmatpush3.bf16.msra.mxu1 %v1065_v4  ;;  %1061 = vmatprep.mubr.msk.f32.mxu1 %vm1165_vm0, %v1166_v25 }
  0x2a   : > { %1067 = vmatprep.subr.bf16.mxu1 %v1164_v3 }
  0x2b   : > { %993 = vmatpush3.bf16.msra.mxu0 %v1139_v41 }
  0x2c   : > { %994 = vmatprep.subr.bf16.mxu0 %v1140_v42 }
  0x2d   : > { %1069 = vmatpush3.bf16.msra.mxu1 %v1068_v6 }
  0x2e   : > { %1070 = vmatprep.subr.bf16.mxu1 %v1164_v3 }
  0x2f   : > { %995 = vmatpush3.bf16.msra.mxu0 %v1141_v43 }
  0x30   : > { %996 = vmatprep.subr.bf16.mxu0 %v1142_v44 }
  0x31   : > { %1072 = vmatpush3.bf16.msra.mxu1 %v1071_v9 }
  0x32   : > { %1073 = vmatprep.subr.bf16.mxu1 %v1164_v3 }
  0x33   : > { %997 = vmatpush3.bf16.msra.mxu0 %v1143_v45 }
  0x34   : > { %998 = vmatprep.subr.bf16.mxu0 %v1144_v46 }
  0x35   : > { %1075 = vmatpush3.bf16.msra.mxu1 %v1074_v12 }
  0x36   : > { %1076 = vmatprep.subr.bf16.mxu1 %v1164_v3 }
  0x37   : > { %999 = vmatpush3.bf16.msra.mxu0 %v1145_v47 }
  0x38   : > { %1000 = vmatprep.subr.bf16.mxu0 %v1146_v49 }
  0x39   : > { %1078 = vmatpush3.bf16.msra.mxu1 %v1077_v15 }
  0x3a   : > { %1079 = vmatprep.subr.bf16.mxu1 %v1164_v3 }
  0x3b   : > { %1001 = vmatpush3.bf16.msra.mxu0 %v1147_v51 }
  0x3c   : > { %1002 = vmatprep.subr.bf16.mxu0 %v1148_v52 }
  0x3d   : > { %1081 = vmatpush3.bf16.msra.mxu1 %v1080_v18 }
  0x3e   : > { %1082 = vmatprep.subr.bf16.mxu1 %v1164_v3 }
  0x3f   : > { %1003 = vmatpush3.bf16.msra.mxu0 %v1149_v53 }
  0x40   : > { %1004 = vmatprep.subr.bf16.mxu0 %v1150_v54 }
  0x41   : > { %1084 = vmatpush3.bf16.msra.mxu1 %v1083_v21 }
  0x42   : > { %1085 = vmatprep.subr.bf16.mxu1 %v1164_v3 }
  0x43   : > { %1005 = vmatpush3.bf16.msra.mxu0 %v1151_v55 }
  0x45   : > { %1087 = vmatpush3.bf16.msra.mxu1 %v1086_v24 }
  0x46   : > { %739 = vmatmul.mubr.bf16.vlgmr.msra.gmra.mrb[4].mxu0 %v894_v56 }
  0xf9   : > { %v962_v27 = vpop.f32.mrb[0].mxu0 }
  0xfa   : > { %v963_v29 = vpop.f32.mrb[1].mxu0 }
  0xfb   : > { %v964_v30 = vadd.f32 %v963_v29, %v962_v27  ;;  %v965_v31 = vpop.f32.mrb[2].mxu0  ;;  %v984_v32 = vpop.f32.mrb[0].mxu1 }
  0xfc   : > { %v966_v33 = vpop.f32.mrb[3].mxu0  ;;  %v985_v34 = vpop.f32.mrb[1].mxu1 }
  0xfd   : > { %v661_v35 = vadd.f32 %v964_v30, %v316_v28  ;;  %v986_v36 = vadd.f32 %v985_v34, %v984_v32  ;;  %v987_v37 = vpop.f32.mrb[2].mxu1 }
  0xfe   : > { %v988_v38 = vpop.f32.mrb[3].mxu1 }
  0xff   : > { %v701_v39 = vadd.f32 %v986_v36, %v661_v35 }
 0x119   : > { %v1006_v40 = vpop.f32.mrb[4].mxu0 }
 0x11a   : > { %v1007_v41 = vpop.f32.mrb[5].mxu0 }
 0x11b   : > { %v1008_v42 = vadd.f32 %v1007_v41, %v1006_v40  ;;  %v1009_v43 = vpop.f32.mrb[6].mxu0 }
 0x11c   : > { %v1010_v44 = vpop.f32.mrb[7].mxu0 }
 0x11d   : > { %v741_v45 = vadd.f32 %v1008_v42, %v701_v39 }
 0x11f   : > { %v746_v46 = vmul.f32 %v741_v45, %v741_v45 }
 0x121   : > { %1062 = vmatmul.mubr.f32.vlgmr.msra.gmra.mrb[4].mxu1 %v746_v46 }
 0x1f4   : > { %v813_v47 = vpop.f32.mrb[4].mxu1 }
 0x1f5   : > { %v814_v48 = vadd.f32 1e-05, %v813_v47  ;;  %v1063_v49 = vpop.f32.mrb[5].mxu1 }
 0x1f7   : > { %1154 = vrsqrt.f32 %v814_v48 }
 0x201   : > { %v1155_v50 = vpop.eup %1154 }
 0x202   : > { %v818_v51 = vmul.f32 %v1155_v50, %v741_v45 }
 0x204   : > { %v823_v52 = vmul.f32 %v1362_v62, %v818_v51 }
 0x206   : > { %v828_v53 = vadd.f32 %v1364_v63, %v823_v52 }
 0x208   : > { %829 = vst [vmem:[%s195_s9] sm:$0xff] %v828_v53 }
 0x209 PF: > { %s14_s15 = sadd.s32 1, %s1162_s15  }
 0x20a   : > { %p11_p4 = scmp.ge.s32.totalorder %s14_s15, 4  }
 0x20c   :  { %13 = sbr.rel (!%p11_p4) target bundleno = 1 (0x1), region = 66 }

</bundles_post_ra>
